<compile_context>
chip_gen: v6e
topology: v6e:2x2x1
jax: 0.10.0
libtpu: 0.0.40
codegen_flags: <defaults>
</compile_context>

<pallas_src>
import jax
import jax.numpy as jnp
from jax.experimental import pallas as pl
from jax.experimental.pallas import tpu as pltpu

LANE = 128


def _round_up(n, m):
    return ((n + m - 1) // m) * m


def _mlp_kernel(x_ref, w1_ref, b1_ref, w2_ref, b2_ref, o_ref):
    # fc1 + ReLU.  Hidden dim is lane-padded to 128 -> h is lane-dense.
    h = jnp.dot(x_ref[...], w1_ref[...], preferred_element_type=jnp.float32)
    h = jnp.maximum(h + b1_ref[...], 0.0)                     # (TB, Hp) + (1, Hp)
    # fc2 (+bias): output has only the O real lanes (no padded-lane work).
    y = jnp.dot(h, w2_ref[...], preferred_element_type=jnp.float32) + b2_ref[...]
    # sigmoid(y) = 0.5*tanh(0.5*y) + 0.5  -> single EUP push + one VPU FMA.
    o_ref[...] = (0.5 * jnp.tanh(0.5 * y) + 0.5).astype(o_ref.dtype)


def prepare_params(w1, b1, w2, b2):
    """One-time (init-time) parameter prep.

    w1: (H, F), b1: (H,), w2: (O, H), b2: (O,)   [PyTorch nn.Linear layout]
    Returns weights transposed to (in, out); the hidden dim is zero-padded to
    a multiple of 128 lanes (exact through matmul + bias + ReLU).  The output
    dim is kept at the true O so the kernel stores only real lanes.
    """
    H, F = w1.shape
    O, _ = w2.shape
    Hp = _round_up(H, LANE)
    w1p = jnp.zeros((F, Hp), jnp.float32).at[:, :H].set(jnp.transpose(w1))
    b1p = jnp.zeros((1, Hp), jnp.float32).at[:, :H].set(b1)
    w2p = jnp.zeros((Hp, O), jnp.float32).at[:H, :].set(jnp.transpose(w2))
    b2p = jnp.asarray(b2, jnp.float32).reshape(1, O)
    return w1p, b1p, w2p, b2p


def _forward_gridless(x, w1p, b1p, w2p, b2p):
    # Whole arrays resident in VMEM (explicit placement); no grid / pipeline
    # machinery for batches that are pure fixed overhead anyway.
    B = x.shape[0]
    O = w2p.shape[1]
    vspec = pl.BlockSpec(memory_space=pltpu.MemorySpace.VMEM)
    return pl.pallas_call(
        _mlp_kernel,
        out_shape=jax.ShapeDtypeStruct((B, O), jnp.float32),
        in_specs=[vspec, vspec, vspec, vspec, vspec],
        out_specs=vspec,
    )(x, w1p, b1p, w2p, b2p)


def _forward_batched(x, w1p, b1p, w2p, b2p, *, batch_tile):
    B, F = x.shape
    Hp = w1p.shape[1]
    O = w2p.shape[1]
    assert batch_tile % 8 == 0, "batch_tile must be a multiple of 8 (f32 sublane)"

    grid = (pl.cdiv(B, batch_tile),)          # ragged tail handled by masked last block
    # Per-row VMEM: x block ~512 B (lane-padded), out block ~512 B, h ~512 B;
    # x/out are double-buffered -> ~2.5 KiB/row.  Give headroom, cap below
    # v7x's 64 MiB physical VMEM.
    vmem_limit = min(48 * 1024 * 1024, batch_tile * 3 * 1024 + 4 * 1024 * 1024)

    return pl.pallas_call(
        _mlp_kernel,
        out_shape=jax.ShapeDtypeStruct((B, O), jnp.float32),
        grid=grid,
        in_specs=[
            pl.BlockSpec((batch_tile, F), lambda i: (i, 0)),   # stream x tiles
            pl.BlockSpec((F, Hp), lambda i: (0, 0)),           # weights / biases stay
            pl.BlockSpec((1, Hp), lambda i: (0, 0)),           #   VMEM-resident
            pl.BlockSpec((Hp, O), lambda i: (0, 0)),
            pl.BlockSpec((1, O), lambda i: (0, 0)),
        ],
        out_specs=pl.BlockSpec((batch_tile, O), lambda i: (i, 0)),
        compiler_params=pltpu.CompilerParams(
            dimension_semantics=("parallel",),
            vmem_limit_bytes=vmem_limit,
        ),
    )(x, w1p, b1p, w2p, b2p)


def model_2_forward(x, w1p, b1p, w2p, b2p, *, batch_tile=8192, gridless_max=1024):
    """x: (B, bert_output_size) float32 'BERT output' features.
    w1p/b1p/w2p/b2p: outputs of prepare_params (pre-transposed, hidden-padded).
    Returns (B, out_class_number) float32 = sigmoid(fc2(relu(fc1(x))))."""
    B = x.shape[0]
    if B <= gridless_max:
        return _forward_gridless(x, w1p, b1p, w2p, b2p)
    # Force at least 2 grid steps so the "parallel" batch axis shards across
    # both v7x TensorCores (harmless on v5e/v6e); cap the tile at batch_tile.
    tile = min(batch_tile, _round_up((B + 1) // 2, 8))
    return _forward_batched(x, w1p, b1p, w2p, b2p, batch_tile=tile)


if __name__ == "__main__":
    bert_output_size = 5
    fc_hidden_size = 10
    out_class_number = 30

    key = jax.random.PRNGKey(0)
    kx, kx2, k1, k2, k3, k4 = jax.random.split(key, 6)

    # Deterministic synthetic "BERT output" features and Linear parameters
    # (shapes match nn.Linear(5, 10) and nn.Linear(10, 30)).
    w1 = jax.random.normal(k1, (fc_hidden_size, bert_output_size), jnp.float32) * 0.1
    b1 = jax.random.normal(k2, (fc_hidden_size,), jnp.float32) * 0.1
    w2 = jax.random.normal(k3, (out_class_number, fc_hidden_size), jnp.float32) * 0.1
    b2 = jax.random.normal(k4, (out_class_number,), jnp.float32) * 0.1

    # One-time parameter prep (transpose + hidden-lane padding).
    w1p, b1p, w2p, b2p = prepare_params(w1, b1, w2, b2)

    def reference(xv):
        return jax.nn.sigmoid(jnp.maximum(xv @ w1.T + b1, 0.0) @ w2.T + b2)

    # --- small batch: grid-less VMEM-resident path ------------------------
    x_small = jax.random.normal(kx, (8, bert_output_size), dtype=jnp.float32)
    out_small = jax.block_until_ready(model_2_forward(x_small, w1p, b1p, w2p, b2p))
    assert out_small.shape == (8, out_class_number)
    assert jnp.allclose(out_small, reference(x_small), atol=2e-3), (
        jnp.max(jnp.abs(out_small - reference(x_small))))

    # --- larger, ragged batch: batch-tiled path (grid of 3, masked tail) ---
    x_big = jax.random.normal(kx2, (300, bert_output_size), dtype=jnp.float32)
    out_big = jax.block_until_ready(
        model_2_forward(x_big, w1p, b1p, w2p, b2p, batch_tile=128, gridless_max=64))
    assert out_big.shape == (300, out_class_number)
    assert jnp.allclose(out_big, reference(x_big), atol=2e-3), (
        jnp.max(jnp.abs(out_big - reference(x_big))))

    print("KERNEL_OK")
</pallas_src>

<mosaic_0001>
module attributes {stable_mosaic.version = 11 : i64} {
  func.func @_mlp_kernel(%arg0: memref<8x5xf32, #tpu.memory_space<vmem>>, %arg1: memref<5x128xf32, #tpu.memory_space<vmem>>, %arg2: memref<1x128xf32, #tpu.memory_space<vmem>>, %arg3: memref<128x30xf32, #tpu.memory_space<vmem>>, %arg4: memref<1x30xf32, #tpu.memory_space<vmem>>, %arg5: memref<8x30xf32, #tpu.memory_space<vmem>>) attributes {dimension_semantics = [], scalar_prefetch = 0 : i64, scratch_operands = 0 : i64, tpu.core_type = #tpu.core_type<tc>} {
    %c0 = arith.constant 0 : index
    %c0_0 = arith.constant 0 : index
    %0 = vector.load %arg0[%c0, %c0_0] : memref<8x5xf32, #tpu.memory_space<vmem>>, vector<8x5xf32>
    %c0_1 = arith.constant 0 : index
    %c0_2 = arith.constant 0 : index
    %1 = vector.load %arg1[%c0_1, %c0_2] : memref<5x128xf32, #tpu.memory_space<vmem>>, vector<5x128xf32>
    %cst = arith.constant dense<0.000000e+00> : vector<8x128xf32>
    %2 = tpu.matmul %0, %1, %cst {dimension_numbers = #tpu.dot_dimension_numbers<[1], [0], [0], [1], [0, 0, 1, 1], [], []>} : vector<8x5xf32>, vector<5x128xf32>, vector<8x128xf32> -> vector<8x128xf32>
    %c0_3 = arith.constant 0 : index
    %c0_4 = arith.constant 0 : index
    %3 = vector.load %arg2[%c0_3, %c0_4] : memref<1x128xf32, #tpu.memory_space<vmem>>, vector<1x128xf32>
    %4 = vector.broadcast %3 : vector<1x128xf32> to vector<8x128xf32>
    %5 = arith.addf %2, %4 : vector<8x128xf32>
    %cst_5 = arith.constant 0.000000e+00 : f32
    %6 = vector.broadcast %cst_5 : f32 to vector<8x128xf32>
    %7 = arith.maximumf %5, %6 : vector<8x128xf32>
    %c0_6 = arith.constant 0 : index
    %c0_7 = arith.constant 0 : index
    %8 = vector.load %arg3[%c0_6, %c0_7] : memref<128x30xf32, #tpu.memory_space<vmem>>, vector<128x30xf32>
    %cst_8 = arith.constant dense<0.000000e+00> : vector<8x30xf32>
    %9 = tpu.matmul %7, %8, %cst_8 {dimension_numbers = #tpu.dot_dimension_numbers<[1], [0], [0], [1], [0, 0, 1, 1], [], []>} : vector<8x128xf32>, vector<128x30xf32>, vector<8x30xf32> -> vector<8x30xf32>
    %c0_9 = arith.constant 0 : index
    %c0_10 = arith.constant 0 : index
    %10 = vector.load %arg4[%c0_9, %c0_10] : memref<1x30xf32, #tpu.memory_space<vmem>>, vector<1x30xf32>
    %11 = vector.broadcast %10 : vector<1x30xf32> to vector<8x30xf32>
    %12 = arith.addf %9, %11 : vector<8x30xf32>
    %cst_11 = arith.constant 5.000000e-01 : f32
    %13 = vector.broadcast %cst_11 : f32 to vector<8x30xf32>
    %14 = arith.mulf %13, %12 : vector<8x30xf32>
    %15 = math.tanh %14 : vector<8x30xf32>
    %cst_12 = arith.constant 5.000000e-01 : f32
    %16 = vector.broadcast %cst_12 : f32 to vector<8x30xf32>
    %17 = arith.mulf %16, %15 : vector<8x30xf32>
    %cst_13 = arith.constant 5.000000e-01 : f32
    %18 = vector.broadcast %cst_13 : f32 to vector<8x30xf32>
    %19 = arith.addf %17, %18 : vector<8x30xf32>
    %c0_14 = arith.constant 0 : index
    %c0_15 = arith.constant 0 : index
    %20 = vector.load %arg5[%c0_14, %c0_15] : memref<8x30xf32, #tpu.memory_space<vmem>>, vector<8x30xf32>
    tpu.vector_store %arg5[%c0_14, %c0_15], %19 {strides = array<i32>} : memref<8x30xf32, #tpu.memory_space<vmem>>, vector<8x30xf32>,
    return
  }
}

</mosaic_0001>

<bundles_post_ra>
// kernel: tpu_custom_call.1
= control target key start
LH: loop header
LB: loop body
LE: loop exit
PB: predicated region body
PF: predicated region fallthrough
CT: control target
= control target key end

     0   :  { %vm34_vm0 = vcmask 1044480   ;;  %v312_v2 = vmov 0.0   ;;  %vm313_vm1 = vmmov 0   ;;  %vm30_vm2 = vcmask 39936   ;;  %s408_s0 = inlined_call_operand.vmem [shape: f32[8,5], index: 0, kind: input, shape index: {}]   ;;  %s409_s1 = inlined_call_operand.vmem [shape: f32[5,128], index: 1, kind: input, shape index: {}]   ;;  %s410_s2 = inlined_call_operand.vmem [shape: f32[1,128], index: 2, kind: input, shape index: {}]   ;;  %s411_s3 = inlined_call_operand.vmem [shape: f32[128,30], index: 3, kind: input, shape index: {}]   ;;  %s412_s4 = inlined_call_operand.vmem [shape: f32[1,30], index: 4, kind: input, shape index: {}]   ;;  %s413_s5 = inlined_call_operand.hbm [shape: f32[8,30], index: 5, kind: output, shape index: {}]  }
   0x1   :  { %v22_v0 = vld [vmem:[%s409_s1] sm:$0x1f]  ;;  %245 = vmatprep.subr.mxu0 %v312_v2  ;;  %247 = vmatprep.mubr.msk.f32.mxu0 %vm313_vm1, %v312_v2  ;;  %v124_v3 = vld [vmem:[%s411_s3 + $0x78] sm:$0xff]  ;;  %v123_v4 = vld [vmem:[%s411_s3 + $0x70] sm:$0xff] }
   0x2   :  { %v21_v1 = vld [vmem:[%s408_s0] sm:$0xff]  ;;  %246 = vmatpush3.msk.msra.mxu0 %vm34_vm0, %v22_v0  ;;  %250 = vmatprep.subr.mxu1 %v312_v2  ;;  %v122_v5 = vld [vmem:[%s411_s3 + $0x68] sm:$0xff] }
   0x3   :  { %248 = vmatmul.mubr.msk.f32.vlgmr.msra.gmra.mxu0 %vm30_vm2, %v21_v1  ;;  %251 = vmatpush3.msra.mxu1 %v124_v3 }
   0x4   :  { %252 = vmatprep.subr.mxu1 %v312_v2  ;;  %282 = vmatprep.mubr.msk.f32.mxu1 %vm313_vm1, %v312_v2 }
   0x5   :  { %253 = vmatpush3.msra.mxu1 %v123_v4 }
   0x6   :  { %10 = vsyncpa [#allocation3], 0  ;;  %254 = vmatprep.subr.mxu1 %v312_v2  ;;  %v121_v6 = vld [vmem:[%s411_s3 + $0x60] sm:$0xff]  ;;  %v120_v7 = vld [vmem:[%s411_s3 + $0x58] sm:$0xff]  ;;  %vm206_vm3 = vcmask 244736  }
   0x7   :  { %255 = vmatpush3.msra.mxu1 %v122_v5  ;;  %v119_v8 = vld [vmem:[%s411_s3 + $0x50] sm:$0xff]  ;;  %v118_v9 = vld [vmem:[%s411_s3 + $0x48] sm:$0xff]  ;;  %v117_v10 = vld [vmem:[%s411_s3 + $0x40] sm:$0xff] }
   0x8   :  { %256 = vmatprep.subr.mxu1 %v312_v2  ;;  %v116_v11 = vld [vmem:[%s411_s3 + $0x38] sm:$0xff]  ;;  %v115_v12 = vld [vmem:[%s411_s3 + $0x30] sm:$0xff]  ;;  %v114_v13 = vld [vmem:[%s411_s3 + $0x28] sm:$0xff] }
   0x9   :  { %257 = vmatpush3.msra.mxu1 %v121_v6  ;;  %v113_v14 = vld [vmem:[%s411_s3 + $0x20] sm:$0xff]  ;;  %v112_v15 = vld [vmem:[%s411_s3 + $0x18] sm:$0xff]  ;;  %v111_v16 = vld [vmem:[%s411_s3 + $0x10] sm:$0xff] }
   0xa   :  { %258 = vmatprep.subr.mxu1 %v312_v2  ;;  %v110_v17 = vld [vmem:[%s411_s3 + $0x8] sm:$0xff]  ;;  %v109_v18 = vld [vmem:[%s411_s3] sm:$0xff]  ;;  %s314_s3 = smov [#allocation2]  }
   0xb   :  { %259 = vmatpush3.msra.mxu1 %v120_v7  ;;  %v222_v19 = vld [vmem:[%s410_s2] ss:$0 sm:$0xff]  ;;  %s214_s29 = sshll.u32 %s314_s3, 4  ;;  %s215_s29 = int_to_ptr.vmem [resolvable:$true] %s214_s29 }
   0xc   :  { %260 = vmatprep.subr.mxu1 %v312_v2  ;;  %v225_v24 = vld [vmem:[%s412_s4] ss:$0 sm:$0xff]  ;;  %s290_s2 = scalar_lea.vmem %s215_s29, 128  ;;  %p295_p1 = scmp.lt.s32.totalorder %s215_s29, %s215_s29 }
   0xd   :  { %261 = vmatpush3.msra.mxu1 %v119_v8  ;;  %p291_p0 = scmp.ne.s32.totalorder %s215_s29, %s290_s2  ;;  %p296_p2 = scmp.lt.s32.totalorder %s290_s2, %s290_s2 }
   0xe   :  { %262 = vmatprep.subr.mxu1 %v312_v2 }
   0xf   :  { %263 = vmatpush3.msra.mxu1 %v118_v9  ;;  %p297_p3 = por %p296_p2, %p295_p1 }
  0x10   :  { %264 = vmatprep.subr.mxu1 %v312_v2 }
  0x11   :  { %265 = vmatpush3.msra.mxu1 %v117_v10  ;;  %p298_p4 = pnand %p297_p3, %p291_p0 }
  0x12   :  { %266 = vmatprep.subr.mxu1 %v312_v2 }
  0x13   :  { %267 = vmatpush3.msra.mxu1 %v116_v11 }
  0x14   :  { %268 = vmatprep.subr.mxu1 %v312_v2 }
  0x15   :  { %269 = vmatpush3.msra.mxu1 %v115_v12 }
  0x16   :  { %270 = vmatprep.subr.mxu1 %v312_v2 }
  0x17   :  { %271 = vmatpush3.msra.mxu1 %v114_v13 }
  0x18   :  { %272 = vmatprep.subr.mxu1 %v312_v2 }
  0x19   :  { %273 = vmatpush3.msra.mxu1 %v113_v14 }
  0x1a   :  { %274 = vmatprep.subr.mxu1 %v312_v2 }
  0x1b   :  { %275 = vmatpush3.msra.mxu1 %v112_v15 }
  0x1c   :  { %276 = vmatprep.subr.mxu1 %v312_v2 }
  0x1d   :  { %277 = vmatpush3.msra.mxu1 %v111_v16 }
  0x1e   :  { %278 = vmatprep.subr.mxu1 %v312_v2 }
  0x1f   :  { %279 = vmatpush3.msra.mxu1 %v110_v17 }
  0x20   :  { %280 = vmatprep.subr.mxu1 %v312_v2 }
  0x21   :  { %281 = vmatpush3.msra.mxu1 %v109_v18 }
  0xc3   :  { %v104_v20 = vpop.f32.mrf.mxu0 }
  0xc4   :  { %v105_v21 = vadd.f32 %v222_v19, %v104_v20 }
  0xc5   :  { %v249_v22 = vpop.f32.mrf.mxu0 }
  0xc6   :  { %v108_v23 = vmax.f32 %v105_v21, 0.0 }
  0xc8   :  { %283 = vmatmul.mubr.f32.vlgmr.msra.gmra.mxu1 %v108_v23 }
 0x188   :  { %v198_v25 = vpop.f32.mrf.mxu1 }
 0x189   :  { %v199_v26 = vadd.f32 %v225_v24, %v198_v25 }
 0x18a   :  { %v284_v27 = vpop.f32.mrf.mxu1 }
 0x18b   :  { %v202_v28 = vmul.f32 0.5, %v199_v26 }
 0x18d   :  { %288 = vtanh.f32 %v202_v28 }
 0x19a   :  { %v289_v29 = vpop.eup %288 }
 0x19b   :  { %v204_v30 = vmul.f32 0.5, %v289_v29 }
 0x19d   :  { %v205_v31 = vadd.f32 0.5, %v204_v30 }
 0x19f   :  { %207 = vst.msk [vmem:[#allocation2] sm:$0xff] %vm206_vm3, %v205_v31 }
 0x1a0   :  { %301 = shalt.err (!%p298_p4)
}
 0x1a1   :  { %217 = dma.vmem_to_hbm [thread:$0]  %s215_s29, 128, %s413_s5, [#allocation3]  }
 0x1a2   :  { %310 = dma.done.wait [#allocation3], 128  }
 0x1a3   :  { %311 = vsyncadd [#allocation3], 4294967168 }
 0x1a4   :  { %221 = vsyncpa [#allocation3], 1 }

</bundles_post_ra>
